<compile_context>
chip_gen: v6e
topology: v6e:2x2x1
jax: 0.10.0
libtpu: 0.0.40
codegen_flags: <defaults>
</compile_context>

<pallas_src>
import jax
import jax.numpy as jnp
from jax.experimental import pallas as pl
from jax.experimental.pallas import tpu as pltpu


def _identity_kernel(x_ref, o_ref):
    o_ref[...] = x_ref[...]


def pallas_identity(x):
    """Identity.forward(x) -> x, as a tiled Pallas copy kernel (dtype/shape preserved)."""
    orig_shape = x.shape
    dtype = x.dtype
    n = x.size
    if n == 0:
        return x

    # Lane-dense 2D factorization: prefer a last dim that is a multiple of 128.
    C = None
    for cand in (2048, 1024, 512, 256, 128):
        if n % cand == 0:
            C = cand
            break
    if C is None:
        # Fall back to the natural trailing dim; a full-extent last-dim block is always
        # legal and Mosaic pads it in VMEM (no extra HBM padding pass).
        C = orig_shape[-1] if x.ndim >= 1 else 1
    R = n // C
    x2 = x.reshape(R, C)

    # Row tile: multiple of 8, ~1 MiB per block, so 2 inputs x 2 double-buffers + output
    # stay well under even v7x's 64 MiB VMEM.
    itemsize = jnp.dtype(dtype).itemsize
    target_rows = max(1, (1 << 20) // max(1, C * itemsize))
    tile_r = min(R, target_rows)
    if tile_r != R:
        tile_r = max(8, (tile_r // 8) * 8)

    out = pl.pallas_call(
        _identity_kernel,
        out_shape=jax.ShapeDtypeStruct((R, C), dtype),
        grid=(pl.cdiv(R, tile_r),),
        in_specs=[pl.BlockSpec((tile_r, C), lambda i: (i, 0))],
        out_specs=pl.BlockSpec((tile_r, C), lambda i: (i, 0)),
        compiler_params=pltpu.CompilerParams(
            dimension_semantics=("parallel",)),
    )(x2)
    return out.reshape(orig_shape)


if __name__ == "__main__":
    key = jax.random.PRNGKey(0)
    # small input consistent with the module (Identity accepts any tensor): NCHW-ish
    x = jax.random.normal(key, (2, 4, 16, 16), jnp.float32)

    fwd = jax.jit(pallas_identity)
    y = fwd(x)
    jax.block_until_ready(y)

    assert y.shape == x.shape and y.dtype == x.dtype
    assert bool(jnp.array_equal(y, x))
    print("KERNEL_OK")
</pallas_src>

<mosaic_0001>
module attributes {stable_mosaic.version = 11 : i64} {
  func.func @_identity_kernel(%arg0: i32, %arg1: memref<1x2048xf32, #tpu.memory_space<vmem>>, %arg2: memref<1x2048xf32, #tpu.memory_space<vmem>>) attributes {dimension_semantics = [#tpu.dimension_semantics<parallel>], iteration_bounds = array<i64: 1>, scalar_prefetch = 0 : i64, scratch_operands = 0 : i64, tpu.core_type = #tpu.core_type<tc>, window_params = [{transform_indices = @transform_0, window_bounds = array<i64: 1, 2048>}, {transform_indices = @transform_1, window_bounds = array<i64: 1, 2048>}]} {
    %c0 = arith.constant 0 : index
    %c0_0 = arith.constant 0 : index
    %0 = vector.load %arg1[%c0, %c0_0] : memref<1x2048xf32, #tpu.memory_space<vmem>>, vector<1x2048xf32>
    %c0_1 = arith.constant 0 : index
    %c0_2 = arith.constant 0 : index
    %1 = vector.load %arg2[%c0_1, %c0_2] : memref<1x2048xf32, #tpu.memory_space<vmem>>, vector<1x2048xf32>
    tpu.vector_store %arg2[%c0_1, %c0_2], %0 {strides = array<i32>} : memref<1x2048xf32, #tpu.memory_space<vmem>>, vector<1x2048xf32>,
    return
  }
  func.func @transform_0(%arg0: i32) -> (i32, i32) {
    %c0_i32 = arith.constant 0 : i32
    %c0_i32_0 = arith.constant 0 : i32
    return %arg0, %c0_i32 : i32, i32
  }
  func.func @transform_1(%arg0: i32) -> (i32, i32) {
    %c0_i32 = arith.constant 0 : i32
    %c0_i32_0 = arith.constant 0 : i32
    return %arg0, %c0_i32 : i32, i32
  }
}

</mosaic_0001>

<bundles_post_ra>
// kernel: pallas_identity.1
= control target key start
LH: loop header
LB: loop body
LE: loop exit
PB: predicated region body
PF: predicated region fallthrough
CT: control target
= control target key end

     0   :  { %s38_s0 = inlined_call_operand.vmem [shape: f32[1,2048], index: 0, kind: input, shape index: {}]   ;;  %s39_s1 = inlined_call_operand.vmem [shape: f32[1,2048], index: 1, kind: output, shape index: {}]  }
   0x1   :  { %v8_v0 = vld [vmem:[%s38_s0] sm:$0xff]  ;;  %v9_v1 = vld [vmem:[%s38_s0 + $0x8] sm:$0xff] }
   0x2   :  { %10 = vst [vmem:[%s39_s1] sm:$0xff] %v8_v0  ;;  %11 = vst [vmem:[%s39_s1 + $0x8] sm:$0xff] %v9_v1 }

</bundles_post_ra>
